<compile_context>
chip_gen: v7x
topology: tpu7x:2x2x1
jax: 0.10.0
libtpu: 0.0.40
codegen_flags: <defaults>
</compile_context>

<pallas_src>
import jax
import jax.numpy as jnp
from jax.experimental import pallas as pl
from jax.experimental.pallas import tpu as pltpu

INPUT_SIZE = 8 * 8 * 12 + 3   # 771
HIDDEN = 100
OUTPUT = 1
SEQ_LEN = 8                   # L (rows of input_seq)

GP = 128                      # gate pitch: each live gate in its own 128-lane block
LIVE_GATES = (0, 2, 3)        # PyTorch gate order (i, f, g, o); f dropped (c0 == 0)


def lstm_head_kernel(x_ref, wih_ref, bias_ref, wlin_ref, blin_ref, out_ref):
    """One LSTM step (zero initial state) + linear head, last row only.

    x_ref    : (1, IN)     bf16   last row of input_seq
    wih_ref  : (IN, 3*GP)  bf16   packed live gates [i | g | o]; lanes >= H are 0
    bias_ref : (1, 3*GP)   f32    b_ih + b_hh, packed the same way
    wlin_ref : (1, GP)     f32    linear weight row; lanes >= H are 0
    blin_ref : (1, 1)      f32
    out_ref  : (1, 1)      f32    prediction[-1]
    """
    # MXU: bf16 x bf16 -> f32 accumulation.  h0 @ W_hh^T omitted (h0 == 0).
    gates = jnp.dot(x_ref[...], wih_ref[...],
                    preferred_element_type=jnp.float32) + bias_ref[...]

    # 128-lane-aligned slices: zero-cost views, no relayout.
    i_g = jax.nn.sigmoid(gates[:, 0 * GP:1 * GP])
    g_g = jnp.tanh(gates[:, 1 * GP:2 * GP])
    o_g = jax.nn.sigmoid(gates[:, 2 * GP:3 * GP])

    c = i_g * g_g                  # f_g * c0 == 0 because c0 == 0
    h = o_g * jnp.tanh(c)          # (1, GP); pad lanes are exactly 0

    # Linear head (H -> 1): VPU multiply + lane reduction; pad lanes are
    # masked by the zero-padded wlin row.
    out_ref[...] = (jnp.sum(h * wlin_ref[...], axis=-1, keepdims=True)
                    + blin_ref[...])


def _pack_gate_blocks(mat_t, gate_ids, dtype):
    """mat_t: (rows, 4H).  Lay each selected gate at a 128-lane-aligned block."""
    rows = mat_t.shape[0]
    out = jnp.zeros((rows, GP * len(gate_ids)), dtype)
    for slot, g in enumerate(gate_ids):
        out = out.at[:, slot * GP: slot * GP + HIDDEN].set(
            mat_t[:, g * HIDDEN:(g + 1) * HIDDEN].astype(dtype))
    return out


def pack_params(w_ih, w_hh, b_ih, b_hh, w_lin, b_lin):
    """One-time packing, HOISTED out of the forward path (perf review #2).

    Valid only for the zero-initial-state forward (set_hidden_cell()): W_hh
    and the forget gate are elided because h0 == c0 == 0.
    """
    del w_hh  # h0 == 0  =>  h0 @ W_hh^T == 0
    w_packed = _pack_gate_blocks(w_ih.T, LIVE_GATES, jnp.bfloat16)          # (IN, 3*GP)
    b_packed = _pack_gate_blocks((b_ih + b_hh).reshape(1, -1), LIVE_GATES,
                                 jnp.float32)                               # (1, 3*GP)
    wlin_row = jnp.zeros((1, GP), jnp.float32).at[:, :HIDDEN].set(
        w_lin.reshape(1, HIDDEN).astype(jnp.float32))                       # (1, GP)
    blin = b_lin.reshape(1, 1).astype(jnp.float32)                          # (1, 1)
    return w_packed, b_packed, wlin_row, blin


@jax.jit
def lstm_forward_packed(x, w_packed, b_packed, wlin_row, blin):
    """x: (L, IN) f32.  Returns prediction[-1], shape (1,) — matches PyTorch."""
    # prediction[-1] depends only on x[-1] (single time step, h0 == c0 == 0),
    # so only the last row enters the kernel (perf review #1).
    x_last = x[SEQ_LEN - 1:SEQ_LEN, :].astype(jnp.bfloat16)                 # (1, IN)

    vmem = pl.BlockSpec(memory_space=pltpu.MemorySpace.VMEM)
    # NOTE: for repeated / autoregressive use, give this call a grid over the
    # step axis with constant index_maps for the weight operands so they stay
    # VMEM-resident, or batch B last-rows into an (8*ceil(B/8), IN) LHS.
    pred = pl.pallas_call(
        lstm_head_kernel,
        out_shape=jax.ShapeDtypeStruct((1, OUTPUT), jnp.float32),
        in_specs=[vmem] * 5,
        out_specs=vmem,
    )(x_last, w_packed, b_packed, wlin_row, blin)
    return pred[0]


def lstm_forward(x, w_ih, w_hh, b_ih, b_hh, w_lin, b_lin):
    """Convenience wrapper: packs then calls (packing should be hoisted by callers)."""
    packed = pack_params(w_ih, w_hh, b_ih, b_hh, w_lin, b_lin)
    return lstm_forward_packed(x, *packed)


def init_params(key):
    """Deterministic init matching PyTorch shapes (uniform(-1/sqrt(H), 1/sqrt(H)))."""
    ks = jax.random.split(key, 7)
    bound = 1.0 / jnp.sqrt(jnp.float32(HIDDEN))

    def u(k, shape):
        return jax.random.uniform(k, shape, jnp.float32, -bound, bound)

    w_ih = u(ks[0], (4 * HIDDEN, INPUT_SIZE))   # torch lstm.weight_ih_l0
    w_hh = u(ks[1], (4 * HIDDEN, HIDDEN))       # torch lstm.weight_hh_l0
    b_ih = u(ks[2], (4 * HIDDEN,))
    b_hh = u(ks[3], (4 * HIDDEN,))
    w_lin = u(ks[4], (OUTPUT, HIDDEN))          # torch linear.weight
    b_lin = u(ks[5], (OUTPUT,))
    return w_ih, w_hh, b_ih, b_hh, w_lin, b_lin


if __name__ == "__main__":
    key = jax.random.PRNGKey(0)
    k_x, k_p = jax.random.split(key)

    # input_seq: (L, INPUT_SIZE); hidden_cell starts as zeros (set_hidden_cell()).
    x = jax.random.normal(k_x, (SEQ_LEN, INPUT_SIZE), dtype=jnp.float32)
    params = init_params(k_p)

    # Pack ONCE (hoisted), then run the forward pass.
    packed = pack_params(*params)
    out = lstm_forward_packed(x, *packed)
    out = jax.block_until_ready(out)

    # Pure-JAX reference of the full PyTorch math (including the zero h0/c0 /
    # W_hh terms and all L rows the kernel elides), once mirroring the kernel's
    # bf16 weight/input quantization (tight check) and once in pure f32 (loose).
    w_ih, w_hh, b_ih, b_hh, w_lin, b_lin = params
    h0 = jnp.zeros((SEQ_LEN, HIDDEN), jnp.float32)
    c0 = jnp.zeros((SEQ_LEN, HIDDEN), jnp.float32)

    def reference(xr, wr):
        gates = xr @ wr.T + b_ih + h0 @ w_hh.T + b_hh
        i_g = jax.nn.sigmoid(gates[:, 0 * HIDDEN:1 * HIDDEN])
        f_g = jax.nn.sigmoid(gates[:, 1 * HIDDEN:2 * HIDDEN])
        g_g = jnp.tanh(gates[:, 2 * HIDDEN:3 * HIDDEN])
        o_g = jax.nn.sigmoid(gates[:, 3 * HIDDEN:4 * HIDDEN])
        c = f_g * c0 + i_g * g_g
        h = o_g * jnp.tanh(c)
        return (h @ w_lin.T + b_lin)[-1]

    bf = lambda a: a.astype(jnp.bfloat16).astype(jnp.float32)
    ref_bf16 = reference(bf(x), bf(w_ih))   # same quantization as the kernel
    ref_f32 = reference(x, w_ih)            # exact module math

    # TODO(synk): bf16 weight/input quantization deviates from PyTorch f32 math
    # (loose 5e-2 tolerance vs exact); keep f32 weights if that matters downstream.
    assert jnp.allclose(out, ref_bf16, atol=1e-3, rtol=1e-3), (out, ref_bf16)
    assert jnp.allclose(out, ref_f32, atol=5e-2, rtol=5e-2), (out, ref_f32)

    print("KERNEL_OK")
</pallas_src>

<mosaic_0001>
module attributes {stable_mosaic.version = 11 : i64} {
  func.func @lstm_head_kernel(%arg0: memref<1x771xbf16, #tpu.memory_space<vmem>>, %arg1: memref<771x384xbf16, #tpu.memory_space<vmem>>, %arg2: memref<1x384xf32, #tpu.memory_space<vmem>>, %arg3: memref<1x128xf32, #tpu.memory_space<vmem>>, %arg4: memref<1x1xf32, #tpu.memory_space<vmem>>, %arg5: memref<1x1xf32, #tpu.memory_space<vmem>>) attributes {dimension_semantics = [], scalar_prefetch = 0 : i64, scratch_operands = 0 : i64, tpu.core_type = #tpu.core_type<tc>} {
    %c0 = arith.constant 0 : index
    %c0_0 = arith.constant 0 : index
    %0 = vector.load %arg0[%c0, %c0_0] : memref<1x771xbf16, #tpu.memory_space<vmem>>, vector<1x771xbf16>
    %c0_1 = arith.constant 0 : index
    %c0_2 = arith.constant 0 : index
    %1 = vector.load %arg1[%c0_1, %c0_2] : memref<771x384xbf16, #tpu.memory_space<vmem>>, vector<771x384xbf16>
    %cst = arith.constant dense<0.000000e+00> : vector<1x384xf32>
    %2 = tpu.matmul %0, %1, %cst {dimension_numbers = #tpu.dot_dimension_numbers<[1], [0], [0], [1], [0, 0, 1, 1], [], []>} : vector<1x771xbf16>, vector<771x384xbf16>, vector<1x384xf32> -> vector<1x384xf32>
    %c0_3 = arith.constant 0 : index
    %c0_4 = arith.constant 0 : index
    %3 = vector.load %arg2[%c0_3, %c0_4] : memref<1x384xf32, #tpu.memory_space<vmem>>, vector<1x384xf32>
    %4 = arith.addf %2, %3 : vector<1x384xf32>
    %5 = vector.extract_strided_slice %4 {offsets = [0, 0], sizes = [1, 128], strides = [1, 1]} : vector<1x384xf32> to vector<1x128xf32>
    %6 = arith.negf %5 : vector<1x128xf32>
    %7 = math.exp %6 : vector<1x128xf32>
    %cst_5 = arith.constant 1.000000e+00 : f32
    %8 = vector.broadcast %cst_5 : f32 to vector<1x128xf32>
    %9 = arith.addf %8, %7 : vector<1x128xf32>
    %10 = arith.divf %8, %9 : vector<1x128xf32>
    %11 = vector.extract_strided_slice %4 {offsets = [0, 128], sizes = [1, 128], strides = [1, 1]} : vector<1x384xf32> to vector<1x128xf32>
    %12 = math.tanh %11 : vector<1x128xf32>
    %13 = vector.extract_strided_slice %4 {offsets = [0, 256], sizes = [1, 128], strides = [1, 1]} : vector<1x384xf32> to vector<1x128xf32>
    %14 = arith.negf %13 : vector<1x128xf32>
    %15 = math.exp %14 : vector<1x128xf32>
    %cst_6 = arith.constant 1.000000e+00 : f32
    %16 = vector.broadcast %cst_6 : f32 to vector<1x128xf32>
    %17 = arith.addf %16, %15 : vector<1x128xf32>
    %18 = arith.divf %16, %17 : vector<1x128xf32>
    %19 = arith.mulf %10, %12 : vector<1x128xf32>
    %20 = math.tanh %19 : vector<1x128xf32>
    %21 = arith.mulf %18, %20 : vector<1x128xf32>
    %c0_7 = arith.constant 0 : index
    %c0_8 = arith.constant 0 : index
    %22 = vector.load %arg3[%c0_7, %c0_8] : memref<1x128xf32, #tpu.memory_space<vmem>>, vector<1x128xf32>
    %23 = arith.mulf %21, %22 : vector<1x128xf32>
    %cst_9 = arith.constant dense<0.000000e+00> : vector<1xf32>
    %24 = vector.multi_reduction <add>, %23, %cst_9 [1] : vector<1x128xf32> to vector<1xf32>
    %25 = vector.shape_cast %24 : vector<1xf32> to vector<1x1xf32>
    %c0_10 = arith.constant 0 : index
    %c0_11 = arith.constant 0 : index
    %26 = vector.load %arg4[%c0_10, %c0_11] : memref<1x1xf32, #tpu.memory_space<vmem>>, vector<1x1xf32>
    %27 = arith.addf %25, %26 : vector<1x1xf32>
    %c0_12 = arith.constant 0 : index
    %c0_13 = arith.constant 0 : index
    %28 = vector.load %arg5[%c0_12, %c0_13] : memref<1x1xf32, #tpu.memory_space<vmem>>, vector<1x1xf32>
    tpu.vector_store %arg5[%c0_12, %c0_13], %27 {strides = array<i32>} : memref<1x1xf32, #tpu.memory_space<vmem>>, vector<1x1xf32>,
    return
  }
}

</mosaic_0001>

<bundles_post_ra>
// kernel: lstm_forward_packed.1
= control target key start
LH: loop header
LB: loop body
LE: loop exit
PB: predicated region body
PF: predicated region fallthrough
CT: control target
= control target key end

     0   :  { %s2081_s0 = inlined_call_operand.vmem [shape: bf16[1,771], index: 0, kind: input, shape index: {}]   ;;  %s2082_s1 = inlined_call_operand.hbm [shape: bf16[771,384], index: 1, kind: input, shape index: {}]   ;;  %s2083_s2 = inlined_call_operand.vmem [shape: f32[1,384], index: 2, kind: input, shape index: {}]   ;;  %s2084_s3 = inlined_call_operand.vmem [shape: f32[1,128], index: 3, kind: input, shape index: {}]   ;;  %s2085_s4 = inlined_call_operand.<no memory space> [shape: f32[1,1], index: 4, kind: input, shape index: {}]   ;;  %s2086_s5 = inlined_call_operand.hbm [shape: f32[1,1], index: 5, kind: output, shape index: {}]  }
   0x1   :  { %v10_v0 = vstv %s2085_s4 }
   0x2   :  { %11 = vst [vmem:[#allocation2] sm:$0x1] %v10_v0 }
   0x3   :  { %12 = vsyncpa [#allocation4], 0 }
   0x4   :  { %13 = vsyncpa [#allocation5], 0  ;;  %s1964_s20 = smov [#allocation3]   ;;  %s1916_s24 = scalar_lea.hbm %s2082_s1, 18624 }
   0x5   :  { %s21_s21 = sshll.u32 %s1964_s20, 4  ;;  %p1917_p0 = scmp.ne.s32.totalorder %s2082_s1, %s1916_s24  ;;  %s22_s21 = int_to_ptr.vmem [resolvable:$true] %s21_s21 }
   0x6   :  { %p1920_p1 = scmp.lt.u32.totalorder %s1916_s24, %s2082_s1 }
   0x8   :  { %p1922_p2 = pnand %p1920_p1, %p1917_p0 }
   0xa   :  { %1925 = shalt.err (!%p1922_p2)
}
   0xb   :  { %s1926_s4 = scalar_lea.vmem %s22_s21, 18624  ;;  %p1931_p4 = scmp.lt.s32.totalorder %s22_s21, %s22_s21 }
   0xc   :  { %p1927_p3 = scmp.ne.s32.totalorder %s22_s21, %s1926_s4  ;;  %p1932_p5 = scmp.lt.s32.totalorder %s1926_s4, %s1926_s4 }
   0xe   :  { %p1933_p6 = por %p1932_p5, %p1931_p4 }
  0x10   :  { %p1934_p7 = pnand %p1933_p6, %p1927_p3 }
  0x12   :  { %1937 = shalt.err (!%p1934_p7)
}
  0x13   :  { %s1965_s29 = smov 192   ;;  %s1966_s30 = smov 12  }
  0x14   :  { %27 = dma.hbm_to_vmem [thread:$0]  %s2082_s1, 18624, %s22_s21, [#allocation4], %s1965_s29, %s1965_s29, %s1966_s30  }
  0x15   :  { %1960 = dma.done.wait [#allocation4], 18624  }
  0x16   :  { %1961 = vsyncadd [#allocation4], 4294948672  ;;  %v1708_v1 = vld [vmem:[#allocation3 + $0x4] ss:$12 sps:$4 sm:$0xff]   ;;  %v1712_v3 = vld [vmem:[#allocation3] ss:$12 sps:$4 sm:$0xff]   ;;  %v239_v39 = vlaneseq }
  0x17   :  { %v1710_v2 = vld [vmem:[#allocation3 + $0x184] ss:$12 sps:$4 sm:$0xff]   ;;  %1098 = vmatprep.subr.bf16.mxu1 %v1708_v1  ;;  %v1713_v4 = vld [vmem:[#allocation3 + $0x180] ss:$12 sps:$4 sm:$0xff]   ;;  %v1714_v5 = vld [vmem:[#allocation3 + $0x1c] ss:$12 sps:$4 sm:$0xff]  }
  0x18   :  { %1139 = vmatprep.subr.bf16.mxu0 %v1710_v2  ;;  %1099 = vmatpush1.bf16.msra.mxu1 %v1712_v3  ;;  %v1716_v6 = vld [vmem:[#allocation3 + $0x19c] ss:$12 sps:$4 sm:$0xff]   ;;  %v1718_v7 = vld [vmem:[#allocation3 + $0x18] ss:$12 sps:$4 sm:$0xff]   ;;  %v1720_v9 = vld [vmem:[#allocation3 + $0x34] ss:$12 sps:$4 sm:$0xff]  }
  0x19   :  { %1140 = vmatpush1.bf16.msra.mxu0 %v1713_v4  ;;  %1100 = vmatprep.subr.bf16.mxu1 %v1714_v5  ;;  %v1719_v8 = vld [vmem:[#allocation3 + $0x198] ss:$12 sps:$4 sm:$0xff]   ;;  %v1722_v10 = vld [vmem:[#allocation3 + $0x1b4] ss:$12 sps:$4 sm:$0xff]   ;;  %v1724_v11 = vld [vmem:[#allocation3 + $0x30] ss:$12 sps:$4 sm:$0xff]  }
  0x1a   :  { %1141 = vmatprep.subr.bf16.mxu0 %v1716_v6  ;;  %v1725_v12 = vld [vmem:[#allocation3 + $0x1b0] ss:$12 sps:$4 sm:$0xff]   ;;  %v1726_v13 = vld [vmem:[#allocation3 + $0x4c] ss:$12 sps:$4 sm:$0xff]   ;;  %v1730_v15 = vld [vmem:[#allocation3 + $0x48] ss:$12 sps:$4 sm:$0xff]  }
  0x1b   :  { %v1728_v14 = vld [vmem:[#allocation3 + $0x1cc] ss:$12 sps:$4 sm:$0xff]   ;;  %v1731_v16 = vld [vmem:[#allocation3 + $0x1c8] ss:$12 sps:$4 sm:$0xff]   ;;  %v1732_v17 = vld [vmem:[#allocation3 + $0x64] ss:$12 sps:$4 sm:$0xff]  }
  0x1c   :  { %1101 = vmatpush1.bf16.msra.mxu1 %v1718_v7  ;;  %v1734_v18 = vld [vmem:[#allocation3 + $0x1e4] ss:$12 sps:$4 sm:$0xff]   ;;  %v1736_v19 = vld [vmem:[#allocation3 + $0x60] ss:$12 sps:$4 sm:$0xff]   ;;  %v1738_v21 = vld [vmem:[#allocation3 + $0x7c] ss:$12 sps:$4 sm:$0xff]  }
  0x1d   :  { %1142 = vmatpush1.bf16.msra.mxu0 %v1719_v8  ;;  %1102 = vmatprep.subr.bf16.mxu1 %v1720_v9  ;;  %v1737_v20 = vld [vmem:[#allocation3 + $0x1e0] ss:$12 sps:$4 sm:$0xff]   ;;  %v1740_v22 = vld [vmem:[#allocation3 + $0x1fc] ss:$12 sps:$4 sm:$0xff]   ;;  %v1742_v23 = vld [vmem:[#allocation3 + $0x78] ss:$12 sps:$4 sm:$0xff]  }
  0x1e   :  { %1143 = vmatprep.subr.bf16.mxu0 %v1722_v10  ;;  %v1743_v24 = vld [vmem:[#allocation3 + $0x1f8] ss:$12 sps:$4 sm:$0xff]   ;;  %v1744_v25 = vld [vmem:[#allocation3 + $0x94] ss:$12 sps:$4 sm:$0xff]   ;;  %v1748_v27 = vld [vmem:[#allocation3 + $0x90] ss:$12 sps:$4 sm:$0xff]  }
  0x1f   :  { %v1746_v26 = vld [vmem:[#allocation3 + $0x214] ss:$12 sps:$4 sm:$0xff]   ;;  %v1749_v28 = vld [vmem:[#allocation3 + $0x210] ss:$12 sps:$4 sm:$0xff]   ;;  %v1750_v29 = vld [vmem:[#allocation3 + $0xac] ss:$12 sps:$4 sm:$0xff]  }
  0x20   :  { %1103 = vmatpush1.bf16.msra.mxu1 %v1724_v11  ;;  %v1752_v30 = vld [vmem:[#allocation3 + $0x22c] ss:$12 sps:$4 sm:$0xff]   ;;  %v1754_v31 = vld [vmem:[#allocation3 + $0xa8] ss:$12 sps:$4 sm:$0xff]   ;;  %v1756_v33 = vld [vmem:[#allocation3 + $0xc4] ss:$12 sps:$4 sm:$0xff]  }
  0x21   :  { %1144 = vmatpush1.bf16.msra.mxu0 %v1725_v12  ;;  %1104 = vmatprep.subr.bf16.mxu1 %v1726_v13  ;;  %v1755_v32 = vld [vmem:[#allocation3 + $0x228] ss:$12 sps:$4 sm:$0xff]   ;;  %v1758_v34 = vld [vmem:[#allocation3 + $0x244] ss:$12 sps:$4 sm:$0xff]   ;;  %v1760_v35 = vld [vmem:[#allocation3 + $0xc0] ss:$12 sps:$4 sm:$0xff]  }
  0x22   :  { %1145 = vmatprep.subr.bf16.mxu0 %v1728_v14  ;;  %v1761_v36 = vld [vmem:[#allocation3 + $0x240] ss:$12 sps:$4 sm:$0xff]   ;;  %v1967_v37 = vmov 1966171168   ;;  %v1762_v40 = vld [vmem:[#allocation3 + $0xdc] ss:$12 sps:$4 sm:$0xff]  }
  0x23   :  { %v237_v38 = vunpack.c.l.s4 %v1967_v37  ;;  %v1764_v41 = vld [vmem:[#allocation3 + $0x25c] ss:$12 sps:$4 sm:$0xff]   ;;  %v1766_v42 = vld [vmem:[#allocation3 + $0xd8] ss:$12 sps:$4 sm:$0xff]   ;;  %v2018_v44 = vshrl.u32 %v239_v39, 7  ;;  %vm1085_vm0 = vcmask 1040384  }
  0x24   :  { %1105 = vmatpush1.bf16.msra.mxu1 %v1730_v15  ;;  %v1767_v45 = vld [vmem:[#allocation3 + $0x258] ss:$12 sps:$4 sm:$0xff]   ;;  %v1768_v46 = vld [vmem:[#allocation3 + $0xf4] ss:$12 sps:$4 sm:$0xff]   ;;  %v1772_v48 = vld [vmem:[#allocation3 + $0xf0] ss:$12 sps:$4 sm:$0xff]  }
  0x25   :  { %1146 = vmatpush1.bf16.msra.mxu0 %v1731_v16  ;;  %1106 = vmatprep.subr.bf16.mxu1 %v1732_v17  ;;  %v238_v43 = vunpack.c.0.s8 %v237_v38  ;;  %v1770_v47 = vld [vmem:[#allocation3 + $0x274] ss:$12 sps:$4 sm:$0xff]   ;;  %v1773_v49 = vld [vmem:[#allocation3 + $0x270] ss:$12 sps:$4 sm:$0xff]   ;;  %v1774_v51 = vld [vmem:[#allocation3 + $0x10c] ss:$12 sps:$4 sm:$0xff]  }
  0x26   :  { %1147 = vmatprep.subr.bf16.mxu0 %v1734_v18  ;;  %v1776_v52 = vld [vmem:[#allocation3 + $0x28c] ss:$12 sps:$4 sm:$0xff]   ;;  %v1778_v53 = vld [vmem:[#allocation3 + $0x108] ss:$12 sps:$4 sm:$0xff]   ;;  %v38_v54 = vld [vmem:[%s2081_s0] sm:$0x7f] }
  0x27   :  { %v2021_v50 = vsub.s32 %v238_v43, %v2018_v44  ;;  %v1779_v55 = vld [vmem:[#allocation3 + $0x288] ss:$12 sps:$4 sm:$0xff]   ;;  %v235_v57 = vcombine.high %v38_v54, %v38_v54  ;;  %v1780_v58 = vld [vmem:[#allocation3 + $0x124] ss:$12 sps:$4 sm:$0xff]   ;;  %v1784_v62 = vld [vmem:[#allocation3 + $0x120] ss:$12 sps:$4 sm:$0xff]  }
  0x28   :  { %1107 = vmatpush1.bf16.msra.mxu1 %v1736_v19  ;;  %v1782_v59 = vld [vmem:[#allocation3 + $0x2a4] ss:$12 sps:$4 sm:$0xff]   ;;  %v1785_v63 = vld [vmem:[#allocation3 + $0x2a0] ss:$12 sps:$4 sm:$0xff]   ;;  %v1786_v2 = vld [vmem:[#allocation3 + $0x13c] ss:$12 sps:$4 sm:$0xff]  }
  0x29   :  { %1148 = vmatpush1.bf16.msra.mxu0 %v1737_v20  ;;  %1108 = vmatprep.subr.bf16.mxu1 %v1738_v21  ;;  %v242_v56 = vrot.slane %v38_v54, %v2021_v50  ;;  %v249_v61 = vrot.slane %v235_v57, %v2021_v50  ;;  %v1788_v3 = vld [vmem:[#allocation3 + $0x2bc] ss:$12 sps:$4 sm:$0xff]   ;;  %v1790_v5 = vld [vmem:[#allocation3 + $0x138] ss:$12 sps:$4 sm:$0xff]   ;;  %v1792_v7 = vld [vmem:[#allocation3 + $0x154] ss:$12 sps:$4 sm:$0xff]  }
  0x2a   :  { %1149 = vmatprep.subr.bf16.mxu0 %v1740_v22  ;;  %v1791_v6 = vld [vmem:[#allocation3 + $0x2b8] ss:$12 sps:$4 sm:$0xff]   ;;  %v1794_v8 = vld [vmem:[#allocation3 + $0x2d4] ss:$12 sps:$4 sm:$0xff]   ;;  %v1796_v9 = vld [vmem:[#allocation3 + $0x150] ss:$12 sps:$4 sm:$0xff]  }
  0x2b   :  { %v250_v60 = vcombine.high %v242_v56, %v242_v56  ;;  %v2030_v1 = vrot.slane %v249_v61, %v2021_v50  ;;  %v1797_v10 = vld [vmem:[#allocation3 + $0x2d0] ss:$12 sps:$4 sm:$0xff]   ;;  %v1798_v11 = vld [vmem:[#allocation3 + $0x16c] ss:$12 sps:$4 sm:$0xff]   ;;  %v1802_v13 = vld [vmem:[#allocation3 + $0x168] ss:$12 sps:$4 sm:$0xff]   ;;  %v2036_v14 = vrot.slane %v242_v56, %v2021_v50  ;;  %v251_v19 = vcombine.high %v249_v61, %v249_v61 }
  0x2c   :  { %1109 = vmatpush1.bf16.msra.mxu1 %v1742_v23  ;;  %v1800_v12 = vld [vmem:[#allocation3 + $0x2ec] ss:$12 sps:$4 sm:$0xff]   ;;  %v1803_v15 = vld [vmem:[#allocation3 + $0x2e8] ss:$12 sps:$4 sm:$0xff]   ;;  %v1806_v16 = vld [vmem:[#allocation3 + $0x304] ss:$12 sps:$4 sm:$0xff]  }
  0x2d   :  { %1150 = vmatpush1.bf16.msra.mxu0 %v1743_v24  ;;  %1110 = vmatprep.subr.bf16.mxu1 %v1744_v25  ;;  %v272_v0 = vrot.slane %v250_v60, %v2021_v50  ;;  %v1807_v17 = vld [vmem:[#allocation3 + $0xc8] ss:$12 sps:$4 sm:$0xff]   ;;  %v1804_v18 = vld [vmem:[#allocation3 + $0x300] ss:$12 sps:$4 sm:$0xff]   ;;  %v2040_v20 = vcombine.high %v2036_v14, %v2036_v14  ;;  %v2043_v24 = vrot.slane %v251_v19, %v2021_v50  ;;  %v1809_v25 = vld [vmem:[#allocation3 + $0x318] ss:$12 sps:$4 sm:$0xff]  }
  0x2e   :  { %1151 = vmatprep.subr.bf16.mxu0 %v1746_v26  ;;  %v1808_v21 = vld [vmem:[#allocation3 + $0x8] ss:$12 sps:$4 sm:$0xff]   ;;  %v1812_v23 = vld [vmem:[#allocation3 + $0xe0] ss:$12 sps:$4 sm:$0xff]   ;;  %v1857_v61 = vld [vmem:[#allocation3 + $0x278] ss:$12 sps:$4 sm:$0xff]  }
  0x2f   :  { %v2032_v4 = vcombine.high %v272_v0, %v272_v0  ;;  %1130 = vmatprep.mubr.bf16.mxu1 %v272_v0  ;;  %v1811_v22 = vld [vmem:[#allocation3 + $0x31c] ss:$12 sps:$4 sm:$0xff]   ;;  %v1813_v26 = vld [vmem:[#allocation3 + $0x20] ss:$12 sps:$4 sm:$0xff]   ;;  %vm1086_vm1 = vcmask 1041408   ;;  %vm1081_vm2 = vcmask 23552  }
  0x30   :  { %1111 = vmatpush1.bf16.msra.mxu1 %v1748_v27  ;;  %v1816_v27 = vld [vmem:[#allocation3 + $0x334] ss:$12 sps:$4 sm:$0xff]   ;;  %v1831_v39 = vld [vmem:[#allocation3 + $0x37c] ss:$12 sps:$4 sm:$0xff]   ;;  %v1878_v19 = vld [vmem:[#allocation3 + $0x218] ss:$12 sps:$4 sm:$0xff]  }
  0x31   :  { %1152 = vmatpush1.bf16.msra.mxu0 %v1749_v28  ;;  %1112 = vmatprep.subr.bf16.mxu1 %v1750_v29  ;;  %v1817_v28 = vld [vmem:[#allocation3 + $0xf8] ss:$12 sps:$4 sm:$0xff]   ;;  %v1814_v29 = vld [vmem:[#allocation3 + $0x330] ss:$12 sps:$4 sm:$0xff]   ;;  %v1824_v37 = vld [vmem:[#allocation3 + $0x360] ss:$12 sps:$4 sm:$0xff]  }
  0x32   :  { %1153 = vmatprep.subr.bf16.mxu0 %v1752_v30  ;;  %1171 = vmatprep.mubr.bf16.mxu0 %v2032_v4  ;;  %v1818_v30 = vld [vmem:[#allocation3 + $0x38] ss:$12 sps:$4 sm:$0xff]   ;;  %v1828_v38 = vld [vmem:[#allocation3 + $0x68] ss:$12 sps:$4 sm:$0xff]   ;;  %v1844_v54 = vld [vmem:[#allocation3 + $0x3c0] ss:$12 sps:$4 sm:$0xff]  }
  0x33   :  { %v1836_v43 = vld [vmem:[#allocation3 + $0x394] ss:$12 sps:$4 sm:$0xff]   ;;  %v1851_v56 = vld [vmem:[#allocation3 + $0x3dc] ss:$12 sps:$4 sm:$0xff]   ;;  %vm1971_vm3 = vmmov 0   ;;  %s1972_s11 = smov [#allocation6]  }
  0x34   :  { %1113 = vmatpush1.bf16.msra.mxu1 %v1754_v31  ;;  %v1821_v31 = vld [vmem:[#allocation3 + $0x34c] ss:$12 sps:$4 sm:$0xff]   ;;  %v1839_v50 = vld [vmem:[#allocation3 + $0x3a8] ss:$12 sps:$4 sm:$0xff]   ;;  %s1453_s12 = sshll.u32 %s1972_s11, 4  ;;  %vm1445_vm4 = vcmask 0   ;;  %s1454_s12 = int_to_ptr.vmem [resolvable:$true] %s1453_s12 }
  0x35   :  { %1154 = vmatpush1.bf16.msra.mxu0 %v1755_v32  ;;  %1114 = vmatprep.subr.bf16.mxu1 %v1756_v33  ;;  %v1822_v32 = vld [vmem:[#allocation3 + $0x110] ss:$12 sps:$4 sm:$0xff]   ;;  %v1819_v33 = vld [vmem:[#allocation3 + $0x348] ss:$12 sps:$4 sm:$0xff]   ;;  %v1852_v57 = vld [vmem:[#allocation3 + $0x260] ss:$12 sps:$4 sm:$0xff]   ;;  %p1943_p9 = scmp.lt.s32.totalorder %s1454_s12, %s1454_s12 }
  0x36   :  { %1155 = vmatprep.subr.bf16.mxu0 %v1758_v34  ;;  %v1823_v34 = vld [vmem:[#allocation3 + $0x50] ss:$12 sps:$4 sm:$0xff]   ;;  %v1856_v60 = vld [vmem:[#allocation3 + $0x3f4] ss:$12 sps:$4 sm:$0xff]   ;;  %s1938_s13 = scalar_lea.vmem %s1454_s12, 16  ;;  %s1942_s14 = scalar_lea.vmem %s1454_s12, 32 }
  0x37   :  { %p1939_p8 = scmp.ne.s32.totalorder %s1454_s12, %s1938_s13  ;;  %p1944_p10 = scmp.lt.s32.totalorder %s1942_s14, %s1938_s13 }
  0x38   :  { %1115 = vmatpush1.bf16.msra.mxu1 %v1760_v35  ;;  %v1826_v35 = vld [vmem:[#allocation3 + $0x364] ss:$12 sps:$4 sm:$0xff]  }
  0x39   :  { %1156 = vmatpush1.bf16.msra.mxu0 %v1761_v36  ;;  %1116 = vmatprep.subr.bf16.mxu1 %v1762_v40  ;;  %v1827_v36 = vld [vmem:[#allocation3 + $0x128] ss:$12 sps:$4 sm:$0xff]   ;;  %v1832_v40 = vld [vmem:[#allocation3 + $0x140] ss:$12 sps:$4 sm:$0xff]   ;;  %p1945_p11 = por %p1944_p10, %p1943_p9 }
  0x3a   :  { %1157 = vmatprep.subr.bf16.mxu0 %v1764_v41  ;;  %v1829_v41 = vld [vmem:[#allocation3 + $0x378] ss:$12 sps:$4 sm:$0xff]  }
  0x3b   :  { %p1946_p12 = pnand %p1945_p11, %p1939_p8 }
  0x3c   :  { %1117 = vmatpush1.bf16.msra.mxu1 %v1766_v42  ;;  %v1833_v42 = vld [vmem:[#allocation3 + $0x80] ss:$12 sps:$4 sm:$0xff]  }
  0x3d   :  { %1158 = vmatpush1.bf16.msra.mxu0 %v1767_v45  ;;  %1118 = vmatprep.subr.bf16.mxu1 %v1768_v46  ;;  %v1837_v45 = vld [vmem:[#allocation3 + $0x158] ss:$12 sps:$4 sm:$0xff]   ;;  %v1834_v46 = vld [vmem:[#allocation3 + $0x390] ss:$12 sps:$4 sm:$0xff]  }
  0x3e   :  { %1159 = vmatprep.subr.bf16.mxu0 %v1770_v47  ;;  %v1838_v47 = vld [vmem:[#allocation3 + $0x98] ss:$12 sps:$4 sm:$0xff]  }
  0x40   :  { %1119 = vmatpush1.bf16.msra.mxu1 %v1772_v48  ;;  %v1841_v48 = vld [vmem:[#allocation3 + $0x3ac] ss:$12 sps:$4 sm:$0xff]  }
  0x41   :  { %1160 = vmatpush1.bf16.msra.mxu0 %v1773_v49  ;;  %1120 = vmatprep.subr.bf16.mxu1 %v1774_v51  ;;  %v1842_v49 = vld [vmem:[#allocation3 + $0x170] ss:$12 sps:$4 sm:$0xff]  }
  0x42   :  { %1161 = vmatprep.subr.bf16.mxu0 %v1776_v52  ;;  %v1843_v51 = vld [vmem:[#allocation3 + $0xb0] ss:$12 sps:$4 sm:$0xff]  }
  0x43   :  { %v1846_v52 = vld [vmem:[#allocation3 + $0x3c4] ss:$12 sps:$4 sm:$0xff]  }
  0x44   :  { %1121 = vmatpush1.bf16.msra.mxu1 %v1778_v53  ;;  %v1847_v53 = vld [vmem:[#allocation3 + $0x248] ss:$12 sps:$4 sm:$0xff]  }
  0x45   :  { %1162 = vmatpush1.bf16.msra.mxu0 %v1779_v55  ;;  %1122 = vmatprep.subr.bf16.mxu1 %v1780_v58  ;;  %v1848_v55 = vld [vmem:[#allocation3 + $0x188] ss:$12 sps:$4 sm:$0xff]   ;;  %v1849_v58 = vld [vmem:[#allocation3 + $0x3d8] ss:$12 sps:$4 sm:$0xff]  }
  0x46   :  { %1163 = vmatprep.subr.bf16.mxu0 %v1782_v59  ;;  %v1853_v59 = vld [vmem:[#allocation3 + $0x1a0] ss:$12 sps:$4 sm:$0xff]  }
  0x48   :  { %1123 = vmatpush1.bf16.msra.mxu1 %v1784_v62  ;;  %v1854_v62 = vld [vmem:[#allocation3 + $0x3f0] ss:$12 sps:$4 sm:$0xff]  }
  0x49   :  { %1164 = vmatpush1.bf16.msra.mxu0 %v1785_v63  ;;  %1124 = vmatprep.subr.bf16.mxu1 %v1786_v2  ;;  %v1858_v63 = vld [vmem:[#allocation3 + $0x1b8] ss:$12 sps:$4 sm:$0xff]   ;;  %v1862_v2 = vld [vmem:[#allocation3 + $0x290] ss:$12 sps:$4 sm:$0xff]  }
  0x4a   :  { %1165 = vmatprep.subr.bf16.mxu0 %v1788_v3  ;;  %v1859_v3 = vld [vmem:[#allocation3 + $0x408] ss:$12 sps:$4 sm:$0xff]  }
  0x4c   :  { %1125 = vmatpush1.bf16.msra.mxu1 %v1790_v5  ;;  %v1863_v5 = vld [vmem:[#allocation3 + $0x1d0] ss:$12 sps:$4 sm:$0xff]  }
  0x4d   :  { %1166 = vmatpush1.bf16.msra.mxu0 %v1791_v6  ;;  %1126 = vmatprep.subr.bf16.mxu1 %v1792_v7  ;;  %v1866_v6 = vld [vmem:[#allocation3 + $0x424] ss:$12 sps:$4 sm:$0xff]   ;;  %v1867_v7 = vld [vmem:[#allocation3 + $0x2a8] ss:$12 sps:$4 sm:$0xff]  }
  0x4e   :  { %1167 = vmatprep.subr.bf16.mxu0 %v1794_v8  ;;  %v1864_v8 = vld [vmem:[#allocation3 + $0x420] ss:$12 sps:$4 sm:$0xff]  }
  0x50   :  { %1127 = vmatpush1.bf16.msra.mxu1 %v1796_v9  ;;  %v1868_v9 = vld [vmem:[#allocation3 + $0x1e8] ss:$12 sps:$4 sm:$0xff]  }
  0x51   :  { %1168 = vmatpush1.bf16.msra.mxu0 %v1797_v10  ;;  %1128 = vmatprep.subr.bf16.mxu1 %v1798_v11  ;;  %v1872_v10 = vld [vmem:[#allocation3 + $0x2c0] ss:$12 sps:$4 sm:$0xff]   ;;  %v1869_v11 = vld [vmem:[#allocation3 + $0x438] ss:$12 sps:$4 sm:$0xff]  }
  0x52   :  { %1169 = vmatprep.subr.bf16.mxu0 %v1800_v12  ;;  %v1873_v12 = vld [vmem:[#allocation3 + $0x200] ss:$12 sps:$4 sm:$0xff]  }
  0x54   :  { %1129 = vmatpush1.bf16.msra.mxu1 %v1802_v13  ;;  %v1876_v13 = vld [vmem:[#allocation3 + $0x454] ss:$12 sps:$4 sm:$0xff]  }
  0x55   :  { %1170 = vmatpush1.bf16.msra.mxu0 %v1803_v15  ;;  %1613 = vmatprep.subr.bf16.mxu1 %v1807_v17  ;;  %v231_v15 = vld [vmem:[#allocation3 + $0x480] sm:$0x33] }
  0x56   :  { %1180 = vmatprep.subr.bf16.mxu0 %v1806_v16  ;;  %v1968_v16 = vmov 65535  }
  0x57   :  { %1131 = vmatmul.mubr.bf16.vlgmr.msra.gmra.mrb[0].mxu1 %v2036_v14  ;;  %v1087_v17 = vsel %vm1085_vm0, 4294967295, %v1968_v16 }
  0x58   :  { %1172 = vmatmul.mubr.bf16.vlgmr.msra.gmra.mrb[0].mxu0 %v2040_v20  ;;  %1614 = vmatpush3.bf16.msra.mxu1 %v1808_v21  ;;  %v1881_v21 = vld [vmem:[#allocation3 + $0x46c] ss:$12 sps:$4 sm:$0xff]  }
  0x59   :  { %1181 = vmatpush1.bf16.msra.mxu0 %v1804_v18  ;;  %1615 = vmatprep.subr.bf16.mxu1 %v1812_v23  ;;  %v1874_v18 = vld [vmem:[#allocation3 + $0x450] ss:$12 sps:$4 sm:$0xff]   ;;  %v1607_v23 = vcombine.high %v231_v15, %v231_v15 }
  0x5a   :  { %1182 = vmatprep.subr.bf16.mxu0 %v1811_v22  ;;  %1294 = vmatprep.mubr.bf16.mxu1 %v272_v0  ;;  %v1861_v0 = vld [vmem:[#allocation3 + $0x40c] ss:$12 sps:$4 sm:$0xff]   ;;  %v1882_v22 = vld [vmem:[#allocation3 + $0x2f0] ss:$12 sps:$4 sm:$0xff]  }
  0x5b   :  { %1212 = vmatprep.mubr.bf16.mxu0 %v2043_v24 }
  0x5c   :  { %1616 = vmatpush3.bf16.msra.mxu1 %v1813_v26  ;;  %v1879_v26 = vld [vmem:[#allocation3 + $0x468] ss:$12 sps:$4 sm:$0xff]  }
  0x5d   :  { %1183 = vmatpush1.bf16.msra.mxu0 %v1809_v25  ;;  %1617 = vmatprep.subr.bf16.mxu1 %v1817_v28  ;;  %v1088_v25 = vsel %vm1086_vm1, %v1087_v17, 0  ;;  %v1606_v28 = vcombine.low %v231_v15, %v231_v15 }
  0x5e   :  { %1184 = vmatprep.subr.bf16.mxu0 %v1816_v27  ;;  %v1883_v27 = vld [vmem:[#allocation3 + $0x230] ss:$12 sps:$4 sm:$0xff]  }
  0x60   :  { %1618 = vmatpush3.bf16.msra.mxu1 %v1818_v30  ;;  %v1093_v30 = vand.u32 %v1607_v23, %v1088_v25 }
  0x61   :  { %1185 = vmatpush1.bf16.msra.mxu0 %v1814_v29  ;;  %1619 = vmatprep.subr.bf16.mxu1 %v1822_v32  ;;  %v1885_v29 = vld [vmem:[#allocation3 + $0x3c8] ss:$12 sps:$4 sm:$0xff]   ;;  %v1090_v32 = vand.u32 %v1606_v28, %v1088_v25 }
  0x62   :  { %1186 = vmatprep.subr.bf16.mxu0 %v1821_v31  ;;  %v1886_v31 = vld [vmem:[#allocation3 + $0x308] ss:$12 sps:$4 sm:$0xff]  }
  0x64   :  { %1620 = vmatpush3.bf16.msra.mxu1 %v1823_v34  ;;  %v1888_v34 = vld [vmem:[#allocation3 + $0x320] ss:$12 sps:$4 sm:$0xff]  }
  0x65   :  { %1187 = vmatpush1.bf16.msra.mxu0 %v1819_v33  ;;  %1621 = vmatprep.subr.bf16.mxu1 %v1827_v36  ;;  %v1887_v33 = vld [vmem:[#allocation3 + $0x3e0] ss:$12 sps:$4 sm:$0xff]   ;;  %v1969_v36 = vmov 0  }
  0x66   :  { %1188 = vmatprep.subr.bf16.mxu0 %v1826_v35  ;;  %v1891_v35 = vld [vmem:[#allocation3 + $0x3f8] ss:$12 sps:$4 sm:$0xff]  }
  0x68   :  { %1622 = vmatpush3.bf16.msra.mxu1 %v1828_v38  ;;  %v1892_v38 = vld [vmem:[#allocation3 + $0x338] ss:$12 sps:$4 sm:$0xff]  }
  0x69   :  { %1189 = vmatpush1.bf16.msra.mxu0 %v1824_v37  ;;  %1623 = vmatprep.subr.bf16.mxu1 %v1832_v40  ;;  %v1970_v37 = vmov 0.0   ;;  %v1893_v40 = vld [vmem:[#allocation3 + $0x410] ss:$12 sps:$4 sm:$0xff]  }
  0x6a   :  { %1190 = vmatprep.subr.bf16.mxu0 %v1831_v39  ;;  %v1903_v39 = vld [vmem:[#allocation3 + $0x488] ss:$0 sps:$4 sm:$0x33]  }
  0x6c   :  { %1624 = vmatpush3.bf16.msra.mxu1 %v1833_v42  ;;  %v1096_v42 = vand.u32 %v1903_v39, %v1088_v25 }
  0x6d   :  { %1191 = vmatpush1.bf16.msra.mxu0 %v1829_v41  ;;  %1625 = vmatprep.subr.bf16.mxu1 %v1837_v45  ;;  %v281_v41 = vcombine.high %v2030_v1, %v2030_v1  ;;  %v1896_v45 = vld [vmem:[#allocation3 + $0x368] ss:$12 sps:$4 sm:$0xff]  }
  0x6e   :  { %1192 = vmatprep.subr.bf16.mxu0 %v1836_v43  ;;  %v1895_v43 = vld [vmem:[#allocation3 + $0x428] ss:$12 sps:$4 sm:$0xff]  }
  0x70   :  { %1626 = vmatpush3.bf16.msra.mxu1 %v1838_v47  ;;  %v1899_v47 = vld [vmem:[#allocation3 + $0x458] ss:$12 sps:$4 sm:$0xff]  }
  0x71   :  { %1193 = vmatpush1.bf16.msra.mxu0 %v1834_v46  ;;  %1627 = vmatprep.subr.bf16.mxu1 %v1842_v49  ;;  %v1898_v46 = vld [vmem:[#allocation3 + $0x380] ss:$12 sps:$4 sm:$0xff]   ;;  %v1901_v49 = vld [vmem:[#allocation3 + $0x470] ss:$12 sps:$4 sm:$0xff]  }
  0x72   :  { %1194 = vmatprep.subr.bf16.mxu0 %v1841_v48  ;;  %v1900_v48 = vld [vmem:[#allocation3 + $0x398] ss:$12 sps:$4 sm:$0xff]  }
  0x74   :  { %1628 = vmatpush3.bf16.msra.mxu1 %v1843_v51 }
  0x75   :  { %1195 = vmatpush1.bf16.msra.mxu0 %v1839_v50  ;;  %1635 = vmatprep.subr.bf16.mxu1 %v1847_v53  ;;  %v1902_v50 = vld [vmem:[#allocation3 + $0x3b0] ss:$12 sps:$4 sm:$0xff]  }
  0x76   :  { %1196 = vmatprep.subr.bf16.mxu0 %v1846_v52 }
  0x77   :  { %1295 = vmatmul.mubr.bf16.vlgmr.msra.gmra.mrb[4].mxu1 %v2036_v14  ;;  %v1877_v14 = vld [vmem:[#allocation3 + $0x2d8] ss:$12 sps:$4 sm:$0xff]  }
  0x78   :  { %1636 = vmatpush3.bf16.msra.mxu1 %v1848_v55  ;;  %1334 = vmatprep.mubr.bf16.mxu1 %v2032_v4  ;;  %v1871_v4 = vld [vmem:[#allocation3 + $0x43c] ss:$12 sps:$4 sm:$0xff]  }
  0x79   :  { %1197 = vmatpush1.bf16.msra.mxu0 %v1844_v54  ;;  %1637 = vmatprep.subr.bf16.mxu1 %v1852_v57 }
  0x7a   :  { %1198 = vmatprep.subr.bf16.mxu0 %v1851_v56 }
  0x7c   :  { %1638 = vmatpush3.bf16.msra.mxu1 %v1853_v59 }
  0x7d   :  { %1199 = vmatpush1.bf16.msra.mxu0 %v1849_v58  ;;  %1639 = vmatprep.subr.bf16.mxu1 %v1857_v61  ;;  %v233_v61 = vld [vmem:[%s2083_s2] sm:$0x7] }
  0x7e   :  { %1200 = vmatprep.subr.bf16.mxu0 %v1856_v60  ;;  %v1076_v60 = vsub.s32 2, %v2018_v44 }
  0x80   :  { %1640 = vmatpush3.bf16.msra.mxu1 %v1858_v63 }
  0x81   :  { %1201 = vmatpush1.bf16.msra.mxu0 %v1854_v62  ;;  %1641 = vmatprep.subr.bf16.mxu1 %v1862_v2  ;;  %v1077_v62 = vrot.slane %v233_v61, %v1076_v60 }
  0x82   :  { %1202 = vmatprep.subr.bf16.mxu0 %v1861_v0 }
  0x84   :  { %1642 = vmatpush3.bf16.msra.mxu1 %v1863_v5  ;;  %v1068_v5 = vsub.s32 0, %v2018_v44 }
  0x85   :  { %1203 = vmatpush1.bf16.msra.mxu0 %v1859_v3  ;;  %1643 = vmatprep.subr.bf16.mxu1 %v1867_v7  ;;  %v1072_v7 = vsub.s32 1, %v2018_v44 }
  0x86   :  { %1204 = vmatprep.subr.bf16.mxu0 %v1866_v6 }
  0x88   :  { %1644 = vmatpush3.bf16.msra.mxu1 %v1868_v9  ;;  %v1069_v9 = vrot.slane %v233_v61, %v1068_v5 }
  0x89   :  { %1205 = vmatpush1.bf16.msra.mxu0 %v1864_v8  ;;  %1645 = vmatprep.subr.bf16.mxu1 %v1872_v10 }
  0x8a   :  { %1206 = vmatprep.subr.bf16.mxu0 %v1871_v4  ;;  %v1073_v4 = vrot.slane %v233_v61, %v1072_v7 }
  0x8c   :  { %1646 = vmatpush3.bf16.msra.mxu1 %v1873_v12 }
  0x8d   :  { %1207 = vmatpush1.bf16.msra.mxu0 %v1869_v11  ;;  %1647 = vmatprep.subr.bf16.mxu1 %v1877_v14 }
  0x8e   :  { %1208 = vmatprep.subr.bf16.mxu0 %v1876_v13 }
  0x90   :  { %1648 = vmatpush3.bf16.msra.mxu1 %v1878_v19 }
  0x91   :  { %1209 = vmatpush1.bf16.msra.mxu0 %v1874_v18  ;;  %1649 = vmatprep.subr.bf16.mxu1 %v1882_v22 }
  0x92   :  { %1210 = vmatprep.subr.bf16.mxu0 %v1881_v21 }
  0x94   :  { %1650 = vmatpush3.bf16.msra.mxu1 %v1883_v27 }
  0x95   :  { %1211 = vmatpush1.bf16.msra.mxu0 %v1879_v26  ;;  %1657 = vmatprep.subr.bf16.mxu1 %v1885_v29 }
  0x96   :  { %1221 = vmatprep.subr.bf16.mxu0 %v1093_v30 }
  0x97   :  { %1335 = vmatmul.mubr.bf16.vlgmr.msra.gmra.mrb[8].mxu1 %v2040_v20  ;;  %v1894_v20 = vld [vmem:[#allocation3 + $0x350] ss:$12 sps:$4 sm:$0xff]  }
  0x98   :  { %1213 = vmatmul.mubr.bf16.vlgmr.msra.gmra.mrb[0].mxu0 %v2030_v1  ;;  %1658 = vmatpush3.bf16.msra.mxu1 %v1886_v31 }
  0x99   :  { %1222 = vmatpush1.bf16.msra.mxu0 %v1090_v32  ;;  %1659 = vmatprep.subr.bf16.mxu1 %v1887_v33 }
  0x9a   :  { %1253 = vmatprep.mubr.bf16.mxu0 %v1969_v36  ;;  %1681 = vmatprep.subr.bf16.mxu0 %v1970_v37 }
  0x9b   :  { %1374 = vmatprep.mubr.bf16.mxu1 %v2043_v24  ;;  %v1897_v24 = vld [vmem:[#allocation3 + $0x440] ss:$12 sps:$4 sm:$0xff]  }
  0x9c   :  { %1660 = vmatpush3.bf16.msra.mxu1 %v1888_v34 }
  0x9d   :  { %1661 = vmatprep.subr.bf16.mxu1 %v1891_v35 }
  0xa0   :  { %1662 = vmatpush3.bf16.msra.mxu1 %v1892_v38 }
  0xa1   :  { %1663 = vmatprep.subr.bf16.mxu1 %v1893_v40 }
  0xa4   :  { %1609 = vmatmul.mubr.msk.bf16.vlgmr.msra.gmra.mrb[0].mxu0 %vm1081_vm2, %v281_v41  ;;  %1664 = vmatpush3.bf16.msra.mxu1 %v1894_v20 }
  0xa5   :  { %1682 = vmatpush3.bf16.msra.mxu0 %v1096_v42  ;;  %1665 = vmatprep.subr.bf16.mxu1 %v1895_v43 }
  0xa6   :  { %1683 = vmatprep.mubr.msk.bf16.mxu0 %vm1971_vm3, %v1970_v37 }
  0xa8   :  { %1666 = vmatpush3.bf16.msra.mxu1 %v1896_v45  ;;  %v1443_v45 = vld [vmem:[#allocation2] sm:$0x1] }
  0xa9   :  { %1667 = vmatprep.subr.bf16.mxu1 %v1897_v24 }
  0xac   :  { %1684 = vmatmul.mubr.msk.bf16.vlgmr.msra.gmra.mrb[4].mxu0 %vm1081_vm2, %v281_v41  ;;  %1668 = vmatpush3.bf16.msra.mxu1 %v1898_v46  ;;  %v1438_v41 = vld [vmem:[%s2084_s3] sm:$0x1] }
  0xad   :  { %1669 = vmatprep.subr.bf16.mxu1 %v1899_v47 }
  0xb0   :  { %1670 = vmatpush3.bf16.msra.mxu1 %v1900_v48 }
  0xb1   :  { %1671 = vmatprep.subr.bf16.mxu1 %v1901_v49 }
  0xb4   :  { %1672 = vmatpush3.bf16.msra.mxu1 %v1902_v50 }
  0xb7   :  { %1375 = vmatmul.mubr.bf16.vlgmr.msra.gmra.mrb[12].mxu1 %v2030_v1 }
 0x12a   :  { %v1132_v51 = vpop.f32.mrb[0].mxu1 }
 0x12b   :  { %v1134_v52 = vpop.f32.mrb[1].mxu1  ;;  %v1133_v10 = vadd.f32 %v1132_v51, %v1069_v9 }
 0x12c   :  { %v1136_v53 = vpop.f32.mrb[2].mxu1  ;;  %v1135_v11 = vadd.f32 %v1134_v52, %v1073_v4 }
 0x12d   :  { %v1137_v54 = vpop.f32.mrb[3].mxu1 }
 0x14a   :  { %v1629_v55 = vpop.f32.mrb[4].mxu1 }
 0x14b   :  { %v1630_v56 = vpop.f32.mrb[5].mxu1 }
 0x14c   :  { %v1631_v57 = vadd.f32 %v1630_v56, %v1629_v55  ;;  %v1632_v58 = vpop.f32.mrb[6].mxu1 }
 0x14d   :  { %v1633_v59 = vpop.f32.mrb[7].mxu1 }
 0x14e   :  { %v1297_v2 = vadd.f32 %v1631_v57, %v1077_v62 }
 0x16a   :  { %v1651_v63 = vpop.f32.mrb[8].mxu1 }
 0x16b   :  { %v1652_v0 = vpop.f32.mrb[9].mxu1 }
 0x16c   :  { %v1653_v1 = vadd.f32 %v1652_v0, %v1651_v63  ;;  %v1654_v3 = vpop.f32.mrb[10].mxu1 }
 0x16d   :  { %v1655_v6 = vpop.f32.mrb[11].mxu1 }
 0x16e   :  { %v1337_v8 = vadd.f32 %v1653_v1, %v1297_v2 }
 0x177   :  { %v1255_v12 = vpop.f32.mrb[0].mxu0 }
 0x178   :  { %v1688_v13 = vadd.f32 %v1255_v12, %v1133_v10  ;;  %v1257_v14 = vpop.f32.mrb[1].mxu0 }
 0x179   :  { %v1690_v15 = vadd.f32 %v1257_v14, %v1135_v11  ;;  %v1259_v16 = vpop.f32.mrb[2].mxu0 }
 0x17a   :  { %v1611_v17 = vmul.f32 -1.442695, %v1688_v13  ;;  %v1260_v18 = vpop.f32.mrb[3].mxu0 }
 0x17c   :  { %1904 = vpow2.f32 %v1611_v17 }
 0x17d   :  { %1906 = vtanh.f32 %v1690_v15 }
 0x17f   :  { %v1416_v19 = vpop.f32.mrb[4].mxu0 }
 0x180   :  { %v1685_v21 = vpop.f32.mrb[5].mxu0 }
 0x181   :  { %v1419_v22 = vpop.f32.mrb[6].mxu0 }
 0x182   :  { %v1686_v23 = vpop.f32.mrb[7].mxu0 }
 0x186   :  { %v1905_v25 = vpop.eup %1904 }
 0x187   :  { %v1425_v26 = vadd.f32 1.0, %v1905_v25  ;;  %v1907_v33 = vpop.eup %1906 }
 0x189   :  { %1908 = vrcp.f32 %v1425_v26 }
 0x18a   :  { %v1673_v44 = vpop.f32.mrb[12].mxu1 }
 0x18b   :  { %v1674_v27 = vpop.f32.mrb[13].mxu1 }
 0x18c   :  { %v1675_v28 = vadd.f32 %v1674_v27, %v1673_v44  ;;  %v1676_v29 = vpop.f32.mrb[14].mxu1 }
 0x18d   :  { %v1677_v30 = vpop.f32.mrb[15].mxu1 }
 0x18e   :  { %v1377_v31 = vadd.f32 %v1675_v28, %v1337_v8 }
 0x190   :  { %v1417_v32 = vadd.f32 %v1416_v19, %v1377_v31 }
 0x192   :  { %v1612_v35 = vmul.f32 -1.442695, %v1417_v32 }
 0x193   :  { %v1909_v34 = vpop.eup %1908 }
 0x194   :  { %v1435_v36 = vmul.f32 %v1909_v34, %v1907_v33  ;;  %1910 = vpow2.f32 %v1612_v35 }
 0x196   :  { %1912 = vtanh.f32 %v1435_v36 }
 0x19e   :  { %v1911_v37 = vpop.eup %1910 }
 0x19f   :  { %v1432_v38 = vadd.f32 1.0, %v1911_v37 }
 0x1a0   :  { %v1913_v39 = vpop.eup %1912 }
 0x1a1   :  { %1914 = vrcp.f32 %v1432_v38 }
 0x1ab   :  { %v1915_v40 = vpop.eup %1914 }
 0x1ac   :  { %v1437_v20 = vmul.f32 %v1915_v40, %v1913_v39 }
 0x1ae   :  { %v1439_v42 = vmul.f32 %v1438_v41, %v1437_v20 }
 0x1b0   :  { %v1440_v43 = vsel %vm1085_vm0, %v1439_v42, 0.0 }
 0x1b1   :  { %1441 = vadd.xlane.f32.xlu0 %v1440_v43 }
 0x23e   :  { %v1442_v24 = vpop.xlane.xlu0 %1441 }
 0x23f   :  { %v1444_v46 = vadd.f32 %v1443_v45, %v1442_v24 }
 0x241   :  { %1446 = vst.msk [vmem:[#allocation6] sm:$0x1] %vm1445_vm4, %v1444_v46 }
 0x242   :  { %1949 = shalt.err (!%p1946_p12)
}
 0x243   :  { %s1950_s16 = scalar_lea.hbm %s2086_s5, 16 }
 0x244   :  { %p1951_p13 = scmp.ne.s32.totalorder %s2086_s5, %s1950_s16  ;;  %p1954_p0 = scmp.lt.u32.totalorder %s1950_s16, %s2086_s5 }
 0x246   :  { %p1956_p1 = pnand %p1954_p0, %p1951_p13 }
 0x248   :  { %1959 = shalt.err (!%p1956_p1)
}
 0x249   :  { %1456 = dma.vmem_to_hbm [thread:$0]  %s1454_s12, 16, %s2086_s5, [#allocation5]  }
 0x24a   :  { %1962 = dma.done.wait [#allocation5], 16  }
 0x24b   :  { %1963 = vsyncadd [#allocation5], 4294967280 }
 0x24c   :  { %1460 = vsyncpa [#allocation4], 1 }
 0x24d   :  { %1461 = vsyncpa [#allocation5], 1 }

</bundles_post_ra>
